<compile_context>
chip_gen: v7x
topology: tpu7x:2x2x1
jax: 0.10.0
libtpu: 0.0.40
codegen_flags: <defaults>
</compile_context>

<pallas_src>
import math

import jax
import jax.numpy as jnp
from jax import lax
from jax.experimental import pallas as pl
from jax.experimental.pallas import tpu as pltpu


# If the full (Kp, Op) im2col weight (+ bias, double-buffered) fits under this budget it
# stays resident in VMEM for the whole grid (fetched once) instead of per-M-tile re-DMA.
_RESIDENT_W_BYTES = 10 * 1024 * 1024
_VMEM_LIMIT_BYTES = 32 * 1024 * 1024     # safe scoped-VMEM limit on v5e/v6e/v7x


def _round_up(x, m):
    return (x + m - 1) // m * m


def _pick_tile_n(op):
    """Lane tile: single tile when O is modest, else >=256 to fill the 256-wide MXU."""
    if op <= 512:
        return op
    for cand in (512, 256, 128):
        if op % cand == 0:
            return cand
    return 128


def _pick_tile_k(kp):
    """Reduction tile: whole (padded) K when modest, else the largest 128-multiple divisor."""
    if kp <= 2048:
        return kp
    for cand in (512, 384, 256, 128):
        if kp % cand == 0:
            return cand
    return 128


def _pick_tile_m(m):
    """Large M tiles to amortize per-step overhead, but keep >= 2 tiles so the 'parallel'
    M axis can shard across both v7x TensorCores."""
    m8 = _round_up(max(m, 1), 8)
    for cand in (512, 256, 128):
        if m8 >= 2 * cand:
            return cand
    return m8


# ----------------------------------------------------------------------------
# Pallas kernel: tiled (M, K) @ (K, O) + bias with a float32 VMEM accumulator.
# Grid = (M tiles, O tiles, K tiles); K is the innermost reduction axis.
# ----------------------------------------------------------------------------
def _make_matmul_kernel(resident_w, tn, tk):
    def kernel(p_ref, w_ref, b_ref, o_ref, acc_ref):
        j = pl.program_id(1)
        k = pl.program_id(2)

        @pl.when(k == 0)
        def _init():
            acc_ref[...] = jnp.zeros_like(acc_ref)

        if resident_w:
            # Whole weight lives in VMEM (fetched once); slice this step's (tk, tn) tile.
            w_tile = w_ref[pl.ds(pl.multiple_of(k * tk, 128), tk),
                           pl.ds(pl.multiple_of(j * tn, 128), tn)]
        else:
            w_tile = w_ref[...]

        acc_ref[...] += jnp.dot(p_ref[...], w_tile,
                                preferred_element_type=jnp.float32)

        @pl.when(k == pl.num_programs(2) - 1)
        def _finalize():
            if resident_w:
                b_tile = b_ref[:, pl.ds(pl.multiple_of(j * tn, 128), tn)]
            else:
                b_tile = b_ref[...]
            o_ref[...] = (acc_ref[...] + b_tile).astype(o_ref.dtype)

    return kernel


def _matmul_bias(patches, w_flat, bias, compute_dtype, out_dtype):
    """(m, k) @ (k, o) + bias -> (m, o) in out_dtype, via a padded Pallas matmul."""
    m, kdim = patches.shape
    k2, o = w_flat.shape
    assert kdim == k2

    op = _round_up(o, 128)                  # lane-dense output channels (unmasked vst)
    kp = _round_up(kdim, 128)
    tn = _pick_tile_n(op)
    tk = _pick_tile_k(kp)
    tm = _pick_tile_m(m)
    mp = _round_up(m, tm)

    cd = jnp.dtype(compute_dtype)
    # Cast first, then a single fused jnp.pad per operand (no zeros().at[].set() pass).
    patches = patches.astype(cd)
    if (mp, kp) != (m, kdim):
        patches = jnp.pad(patches, ((0, mp - m), (0, kp - kdim)))
    w_flat = w_flat.astype(cd)
    if (kp, op) != (kdim, o):
        w_flat = jnp.pad(w_flat, ((0, kp - kdim), (0, op - o)))
    bias_row = jnp.pad(bias.astype(jnp.float32)[None, :], ((0, 0), (0, op - o)))

    # Keep the (small) weight + bias fully resident in VMEM when they fit the budget.
    resident_w = 2 * (kp * op * cd.itemsize + op * 4) <= _RESIDENT_W_BYTES
    if resident_w:
        w_spec = pl.BlockSpec((kp, op), lambda i, j, k: (0, 0))
        b_spec = pl.BlockSpec((1, op), lambda i, j, k: (0, 0))
    else:
        w_spec = pl.BlockSpec((tk, tn), lambda i, j, k: (k, j))
        b_spec = pl.BlockSpec((1, tn), lambda i, j, k: (0, j))

    grid = (mp // tm, op // tn, kp // tk)
    flops = 2 * mp * kp * op
    w_bytes = w_flat.size * w_flat.dtype.itemsize
    bytes_accessed = (patches.size * patches.dtype.itemsize
                      + w_bytes * (1 if resident_w else grid[0])
                      + bias_row.size * 4
                      + mp * op * jnp.dtype(out_dtype).itemsize)

    out = pl.pallas_call(
        _make_matmul_kernel(resident_w, tn, tk),
        out_shape=jax.ShapeDtypeStruct((mp, op), jnp.dtype(out_dtype)),
        grid_spec=pltpu.PrefetchScalarGridSpec(
            num_scalar_prefetch=0,
            grid=grid,
            in_specs=[
                pl.BlockSpec((tm, tk), lambda i, j, k: (i, k)),   # im2col patches
                w_spec,                                           # flat conv weight
                b_spec,                                           # bias row
            ],
            out_specs=pl.BlockSpec((tm, tn), lambda i, j, k: (i, j)),
            scratch_shapes=[pltpu.VMEM((tm, tn), jnp.float32)],
        ),
        compiler_params=pltpu.CompilerParams(
            dimension_semantics=("parallel", "parallel", "arbitrary"),
            vmem_limit_bytes=_VMEM_LIMIT_BYTES,
        ),
        cost_estimate=pl.CostEstimate(flops=flops, transcendentals=0,
                                      bytes_accessed=bytes_accessed),
    )(patches, w_flat, bias_row)
    return out[:m, :o]


# ----------------------------------------------------------------------------
# Wrapper-side layout plumbing (zero FLOPs): im2col patch extraction.
# Stride / dilation / zero-padding are folded in here, so the kernel never does
# strided in-VMEM slices or lane-sparse work.
# ----------------------------------------------------------------------------
def _im2col(x_nhwc_padded, kh, kw, sh, sw, dh, dw, hout, wout):
    """-> (N*Hout*Wout, KH*KW*C) with K ordered (kh, kw, c)."""
    n, _, _, c = x_nhwc_padded.shape
    taps = []
    for i in range(kh):
        for j in range(kw):
            taps.append(lax.slice(
                x_nhwc_padded,
                (0, i * dh, j * dw, 0),
                (n, i * dh + (hout - 1) * sh + 1, j * dw + (wout - 1) * sw + 1, c),
                (1, sh, sw, 1)))                       # (N, Hout, Wout, C)
    patches = jnp.stack(taps, axis=3)                  # (N, Hout, Wout, KH*KW, C)
    return patches.reshape(n * hout * wout, kh * kw * c)


# ----------------------------------------------------------------------------
# Module-equivalent wrapper.
# ----------------------------------------------------------------------------
class TransformConv2dPallas:
    def __init__(self, in_channels, out_channels, kernel_size, stride=1,
                 padding=0, dilation=1, groups=1, bias=True, compression_rate=4,
                 compute_dtype=jnp.bfloat16, out_dtype=None, nhwc_output=False,
                 key=None):
        _pair = lambda v: (v, v) if isinstance(v, int) else tuple(v)
        assert groups == 1  # TODO(synk): groups > 1 not implemented in the Pallas path.
        self.in_channels = in_channels
        self.out_channels = out_channels
        self.kernel_size = _pair(kernel_size)
        self.stride = _pair(stride)
        self.padding = _pair(padding)
        self.dilation = _pair(dilation)
        self.groups = groups
        self.compressed_channels = out_channels // compression_rate
        self.compute_dtype = compute_dtype   # bf16 operands by default (all TPU gens)
        self.out_dtype = out_dtype           # None -> same dtype as the input
        self.nhwc_output = nhwc_output       # True: skip the final NHWC->NCHW transpose

        kh, kw = self.kernel_size
        n = in_channels * kh * kw
        stdv = 1.0 / math.sqrt(n)
        key = jax.random.PRNGKey(0) if key is None else key
        k1, k2, k3 = jax.random.split(key, 3)
        # reset_parameters(): uniform(-stdv, stdv) init.
        self.compressed_weight = jax.random.uniform(
            k1, (n, self.compressed_channels), jnp.float32, -stdv, stdv)
        self.transform_mat = jax.random.uniform(
            k2, (self.compressed_channels, out_channels // groups),
            jnp.float32, -stdv, stdv)
        self.bias = (jax.random.uniform(k3, (out_channels,), jnp.float32, -stdv, stdv)
                     if bias else None)

        # Whole forward is jitted so im2col / pad / transposes fuse on the XLA side.
        self._forward = jax.jit(self._forward_impl)

    # -- weight helpers -------------------------------------------------------
    def _transformed_weight(self):
        # Tiny (Cin*KH*KW, Ccomp)@(Ccomp, Cout/g) matmul: a dedicated pallas_call would
        # cost more in launch + DMA than the compute, so this stays a plain jnp.dot.
        return jnp.dot(self.compressed_weight, self.transform_mat)

    def torch_layout_weight(self):
        """mm -> view(Cin,KH,KW,Cout/g) -> permute(0,3,1,2), exactly like the PyTorch code."""
        kh, kw = self.kernel_size
        m4 = self._transformed_weight().reshape(
            self.in_channels, kh, kw, self.out_channels // self.groups)
        return jnp.transpose(m4, (0, 3, 1, 2))        # (Cin, Cout/g, KH, KW) "OIHW"

    def _im2col_weight(self, i_conv, o_conv):
        """Flat (KH*KW*I, O) im2col weight; single transpose+reshape, no OIHW intermediate."""
        kh, kw = self.kernel_size
        m4 = self._transformed_weight().reshape(self.in_channels, kh, kw, i_conv)
        return jnp.transpose(m4, (1, 2, 3, 0)).reshape(kh * kw * i_conv, o_conv)

    # -- forward --------------------------------------------------------------
    def _forward_impl(self, x_nchw):
        kh, kw = self.kernel_size
        sh, sw = self.stride
        ph, pw = self.padding
        dh, dw = self.dilation

        i_conv = self.out_channels // self.groups   # conv "input channels"  (module quirk)
        o_conv = self.in_channels                   # conv "output channels" (module quirk)

        n, c_img, h, w = x_nchw.shape
        assert c_img == i_conv, "input channels must equal out_channels // groups"
        if self.bias is not None:
            assert self.bias.shape[0] == o_conv, (
                "bias is only well-defined when in_channels == out_channels")

        hout = (h + 2 * ph - dh * (kh - 1) - 1) // sh + 1
        wout = (w + 2 * pw - dw * (kw - 1) - 1) // sw + 1

        w_flat = self._im2col_weight(i_conv, o_conv)                   # (K, O)

        cd = self.compute_dtype
        x_nhwc = jnp.transpose(x_nchw, (0, 2, 3, 1)).astype(cd)
        x_nhwc = jnp.pad(x_nhwc, ((0, 0), (ph, ph), (pw, pw), (0, 0)))
        patches = _im2col(x_nhwc, kh, kw, sh, sw, dh, dw, hout, wout)  # (M, K)

        bias = (self.bias if self.bias is not None
                else jnp.zeros((o_conv,), jnp.float32))
        out_dtype = x_nchw.dtype if self.out_dtype is None else self.out_dtype

        out = _matmul_bias(patches, w_flat, bias, cd, out_dtype)       # (M, O)
        out = out.reshape(n, hout, wout, o_conv)
        if self.nhwc_output:
            return out                                 # skip the extra HBM transpose pass
        return jnp.transpose(out, (0, 3, 1, 2))        # NCHW, like F.conv2d

    def __call__(self, x_nchw):
        return self._forward(x_nchw)


# ----------------------------------------------------------------------------
if __name__ == "__main__":
    # small, self-consistent config (in_channels == out_channels, groups == 1)
    N, C, H, W = 2, 8, 16, 16
    x = jax.random.normal(jax.random.PRNGKey(0), (N, C, H, W), jnp.float32)

    # exact (f32 operand) path vs. a plain-JAX conv reference with the same quirky weight
    mod_f32 = TransformConv2dPallas(in_channels=C, out_channels=C, kernel_size=3,
                                    stride=1, padding=1, dilation=1, groups=1,
                                    bias=True, compression_rate=4,
                                    compute_dtype=jnp.float32,
                                    key=jax.random.PRNGKey(1))
    out_f32 = jax.block_until_ready(mod_f32(x))

    w_oihw = mod_f32.torch_layout_weight()
    ref = lax.conv_general_dilated(
        x, w_oihw, window_strides=mod_f32.stride,
        padding=[(mod_f32.padding[0],) * 2, (mod_f32.padding[1],) * 2],
        rhs_dilation=mod_f32.dilation,
        dimension_numbers=("NCHW", "OIHW", "NCHW"),
        precision=lax.Precision.HIGHEST)
    ref = ref + mod_f32.bias[None, :, None, None]

    assert out_f32.shape == (N, C, H, W), out_f32.shape
    err = float(jnp.max(jnp.abs(out_f32 - ref)))
    assert err < 1e-4, err

    # default bf16-operand path (MXU-native on v5e/v6e/v7x); accumulation stays f32
    mod_bf16 = TransformConv2dPallas(in_channels=C, out_channels=C, kernel_size=3,
                                     stride=1, padding=1, dilation=1, groups=1,
                                     bias=True, compression_rate=4,
                                     key=jax.random.PRNGKey(1))
    out_bf16 = jax.block_until_ready(mod_bf16(x))
    err_bf16 = float(jnp.max(jnp.abs(out_bf16 - ref)))
    assert err_bf16 < 1e-1, err_bf16

    # also exercise the tiled-weight fallback path (force the resident budget to zero)
    _RESIDENT_W_BYTES = 0
    mod_tiled = TransformConv2dPallas(in_channels=C, out_channels=C, kernel_size=3,
                                      stride=1, padding=1, dilation=1, groups=1,
                                      bias=True, compression_rate=4,
                                      compute_dtype=jnp.float32,
                                      key=jax.random.PRNGKey(1))
    out_tiled = jax.block_until_ready(mod_tiled(x))
    err_tiled = float(jnp.max(jnp.abs(out_tiled - ref)))
    assert err_tiled < 1e-4, err_tiled

    print("KERNEL_OK")
</pallas_src>

<mosaic_0001>
module attributes {stable_mosaic.version = 11 : i64} {
  func.func @kernel(%arg0: i32, %arg1: i32, %arg2: i32, %arg3: memref<256x128xf32, #tpu.memory_space<vmem>>, %arg4: memref<128x128xf32, #tpu.memory_space<vmem>>, %arg5: memref<1x128xf32, #tpu.memory_space<vmem>>, %arg6: memref<256x128xf32, #tpu.memory_space<vmem>>, %arg7: memref<256x128xf32, #tpu.memory_space<vmem>>) attributes {dimension_semantics = [#tpu.dimension_semantics<parallel>, #tpu.dimension_semantics<parallel>, #tpu.dimension_semantics<arbitrary>], iteration_bounds = array<i64: 2, 1, 1>, scalar_prefetch = 0 : i64, scratch_operands = 1 : i64, tpu.core_type = #tpu.core_type<tc>, window_params = [{transform_indices = @transform_0, window_bounds = array<i64: 256, 128>}, {pipeline_mode = #tpu.pipeline_mode<synchronous>, transform_indices = @transform_1, window_bounds = array<i64: 128, 128>}, {pipeline_mode = #tpu.pipeline_mode<synchronous>, transform_indices = @transform_2, window_bounds = array<i64: 1, 128>}, {transform_indices = @transform_3, window_bounds = array<i64: 256, 128>}]} {
    %c0_i32 = arith.constant 0 : i32
    %0 = arith.cmpi eq, %arg2, %c0_i32 : i32
    %1 = arith.extui %0 : i1 to i32
    %c0_i32_0 = arith.constant 0 : i32
    %2 = arith.cmpi ne, %1, %c0_i32_0 : i32
    scf.if %2 {
      %cst_9 = arith.constant 0.000000e+00 : f32
      %18 = vector.broadcast %cst_9 : f32 to vector<256x128xf32>
      %c0_10 = arith.constant 0 : index
      %c0_11 = arith.constant 0 : index
      %19 = vector.load %arg7[%c0_10, %c0_11] : memref<256x128xf32, #tpu.memory_space<vmem>>, vector<256x128xf32>
      tpu.vector_store %arg7[%c0_10, %c0_11], %18 {strides = array<i32>} : memref<256x128xf32, #tpu.memory_space<vmem>>, vector<256x128xf32>,
    } else {
    }
    %c128_i32 = arith.constant 128 : i32
    %3 = arith.muli %arg2, %c128_i32 : i32
    %4 = tpu.assume_multiple %3, 128 : i32
    %c128_i32_1 = arith.constant 128 : i32
    %5 = arith.muli %arg1, %c128_i32_1 : i32
    %6 = tpu.assume_multiple %5, 128 : i32
    %7 = arith.index_cast %4 : i32 to index
    %8 = arith.index_cast %6 : i32 to index
    %9 = vector.load %arg4[%7, %8] : memref<128x128xf32, #tpu.memory_space<vmem>>, vector<128x128xf32>
    %c0 = arith.constant 0 : index
    %c0_2 = arith.constant 0 : index
    %10 = vector.load %arg7[%c0, %c0_2] : memref<256x128xf32, #tpu.memory_space<vmem>>, vector<256x128xf32>
    %c0_3 = arith.constant 0 : index
    %c0_4 = arith.constant 0 : index
    %11 = vector.load %arg3[%c0_3, %c0_4] : memref<256x128xf32, #tpu.memory_space<vmem>>, vector<256x128xf32>
    %cst = arith.constant dense<0.000000e+00> : vector<256x128xf32>
    %12 = tpu.matmul %11, %9, %cst {dimension_numbers = #tpu.dot_dimension_numbers<[1], [0], [0], [1], [0, 0, 1, 1], [], []>} : vector<256x128xf32>, vector<128x128xf32>, vector<256x128xf32> -> vector<256x128xf32>
    %13 = arith.addf %10, %12 : vector<256x128xf32>
    %c0_5 = arith.constant 0 : index
    %c0_6 = arith.constant 0 : index
    %14 = vector.load %arg7[%c0_5, %c0_6] : memref<256x128xf32, #tpu.memory_space<vmem>>, vector<256x128xf32>
    tpu.vector_store %arg7[%c0_5, %c0_6], %13 {strides = array<i32>} : memref<256x128xf32, #tpu.memory_space<vmem>>, vector<256x128xf32>,
    %c0_i32_7 = arith.constant 0 : i32
    %15 = arith.cmpi eq, %arg2, %c0_i32_7 : i32
    %16 = arith.extui %15 : i1 to i32
    %c0_i32_8 = arith.constant 0 : i32
    %17 = arith.cmpi ne, %16, %c0_i32_8 : i32
    scf.if %17 {
      %c128_i32_9 = arith.constant 128 : i32
      %18 = arith.muli %arg1, %c128_i32_9 : i32
      %19 = tpu.assume_multiple %18, 128 : i32
      %c0_10 = arith.constant 0 : index
      %20 = arith.index_cast %19 : i32 to index
      %21 = vector.load %arg5[%c0_10, %20] : memref<1x128xf32, #tpu.memory_space<vmem>>, vector<1x128xf32>
      %c0_11 = arith.constant 0 : index
      %c0_12 = arith.constant 0 : index
      %22 = vector.load %arg7[%c0_11, %c0_12] : memref<256x128xf32, #tpu.memory_space<vmem>>, vector<256x128xf32>
      %23 = vector.broadcast %21 : vector<1x128xf32> to vector<256x128xf32>
      %24 = arith.addf %22, %23 : vector<256x128xf32>
      %c0_13 = arith.constant 0 : index
      %c0_14 = arith.constant 0 : index
      %25 = vector.load %arg6[%c0_13, %c0_14] : memref<256x128xf32, #tpu.memory_space<vmem>>, vector<256x128xf32>
      tpu.vector_store %arg6[%c0_13, %c0_14], %24 {strides = array<i32>} : memref<256x128xf32, #tpu.memory_space<vmem>>, vector<256x128xf32>,
    } else {
    }
    return
  }
  func.func @transform_0(%arg0: i32, %arg1: i32, %arg2: i32) -> (i32, i32) {
    %c0_i32 = arith.constant 0 : i32
    return %arg0, %arg2 : i32, i32
  }
  func.func @transform_1(%arg0: i32, %arg1: i32, %arg2: i32) -> (i32, i32) {
    %c0_i32 = arith.constant 0 : i32
    %c0_i32_0 = arith.constant 0 : i32
    %c0_i32_1 = arith.constant 0 : i32
    return %c0_i32, %c0_i32_0 : i32, i32
  }
  func.func @transform_2(%arg0: i32, %arg1: i32, %arg2: i32) -> (i32, i32) {
    %c0_i32 = arith.constant 0 : i32
    %c0_i32_0 = arith.constant 0 : i32
    %c0_i32_1 = arith.constant 0 : i32
    return %c0_i32, %c0_i32_0 : i32, i32
  }
  func.func @transform_3(%arg0: i32, %arg1: i32, %arg2: i32) -> (i32, i32) {
    %c0_i32 = arith.constant 0 : i32
    return %arg0, %arg1 : i32, i32
  }
}

</mosaic_0001>

<bundles_post_ra>
// kernel: _forward_impl.1
= control target key start
LH: loop header
LB: loop body
LE: loop exit
PB: predicated region body
PF: predicated region fallthrough
CT: control target
= control target key end

     0   :  { %s1071_s12 = smov 0   ;;  %s1073_s13 = smov 0   ;;  %s1264_s0 = inlined_call_operand.vmem [shape: f32[512,128], index: 0, kind: input, shape index: {}]   ;;  %s1265_s1 = inlined_call_operand.vmem [shape: f32[128,128], index: 1, kind: input, shape index: {}]   ;;  %s1266_s2 = inlined_call_operand.vmem [shape: f32[1,128], index: 2, kind: input, shape index: {}]   ;;  %s1267_s3 = inlined_call_operand.vmem [shape: f32[512,128], index: 3, kind: output, shape index: {}]  }
   0x1   :  { %s1075_s14 = smov 0  }
   0x2 LB: > { %s32_s15 = sadd.s32 1, %s1045_s13  ;;  %p819_p0 = scmp.ge.s32.totalorder %s1049_s14, 1  ;;  %s1049_s14 = sphi %s1075_s14, %s13_s14   ;;  %s1045_s13 = sphi %s1073_s13, %s1269_s13   ;;  %s1041_s12 = sphi %s1071_s12, %s1268_s12  }
   0x3   : > { %p34_p1 = scmp.ge.s32.totalorder %s32_s15, 2  ;;  %p164_p2 = scmp.lt.s32.totalorder %s1049_s14, 3 }
   0x5   : > { %s1271_s15 = smov (%p34_p1, %s32_s15), 0  ;;  %p165_p3 = pnand %p819_p0, %p164_p2 }
   0x6   : > { %v254_v0 = vld [vmem:[%s1265_s1] sm:$0xff] (!%p165_p3)  ;;  %v255_v1 = vld [vmem:[%s1265_s1 + $0x8] sm:$0xff] (!%p165_p3)  ;;  %v256_v2 = vld [vmem:[%s1265_s1 + $0x10] sm:$0xff] (!%p165_p3)  ;;  %s820_s22 = sshll.u32 (!%p165_p3), %s1041_s12, 5 }
   0x7   : > { %168 = sbr.rel (%p165_p3) target bundleno = 286 (0x11e), region = 32  ;;  %v955_v3 = vpack.c.bf16 (!%p165_p3), %v255_v1, %v254_v0  ;;  %v257_v4 = vld [vmem:[%s1265_s1 + $0x18] sm:$0xff] (!%p165_p3)  ;;  %p195_p4 = scmp.lt.s32.totalorder (!%p165_p3), %s820_s22, 63  ;;  %v258_v6 = vld [vmem:[%s1265_s1 + $0x20] sm:$0xff] (!%p165_p3)  ;;  %v259_v7 = vld [vmem:[%s1265_s1 + $0x28] sm:$0xff] (!%p165_p3) }
   0x8   : > { %v959_v5 = vpack.c.bf16 (!%p165_p3), %v257_v4, %v256_v2  ;;  %v963_v8 = vpack.c.bf16 (!%p165_p3), %v259_v7, %v258_v6  ;;  %v260_v9 = vld [vmem:[%s1265_s1 + $0x30] sm:$0xff] (!%p165_p3)  ;;  %v261_v10 = vld [vmem:[%s1265_s1 + $0x38] sm:$0xff] (!%p165_p3)  ;;  %v262_v14 = vld [vmem:[%s1265_s1 + $0x40] sm:$0xff] (!%p165_p3) }
   0x9   : > { %956 = vmatprep.subr.bf16.mxu0 (!%p165_p3), %v955_v3  ;;  %987 = vmatprep.subr.bf16.mxu1 (!%p165_p3), %v955_v3  ;;  %v967_v13 = vpack.c.bf16 (!%p165_p3), %v261_v10, %v260_v9  ;;  %v263_v15 = vld [vmem:[%s1265_s1 + $0x48] sm:$0xff] (!%p165_p3)  ;;  %v264_v17 = vld [vmem:[%s1265_s1 + $0x50] sm:$0xff] (!%p165_p3)  ;;  %v265_v18 = vld [vmem:[%s1265_s1 + $0x58] sm:$0xff] (!%p165_p3) }
   0xa   : > { %958 = vmatpush3.bf16.msra.mxu0 (!%p165_p3), %v955_v3  ;;  %995 = vmatpush3.bf16.msra.mxu1 (!%p165_p3), %v955_v3  ;;  %v971_v16 = vpack.c.bf16 (!%p165_p3), %v263_v15, %v262_v14  ;;  %v975_v19 = vpack.c.bf16 (!%p165_p3), %v265_v18, %v264_v17  ;;  %v266_v20 = vld [vmem:[%s1265_s1 + $0x60] sm:$0xff] (!%p165_p3)  ;;  %v267_v21 = vld [vmem:[%s1265_s1 + $0x68] sm:$0xff] (!%p165_p3)  ;;  %v268_v23 = vld [vmem:[%s1265_s1 + $0x70] sm:$0xff] (!%p165_p3) }
   0xb   : > { %960 = vmatprep.subr.bf16.mxu0 (!%p165_p3), %v959_v5  ;;  %988 = vmatprep.subr.bf16.mxu1 (!%p165_p3), %v959_v5  ;;  %v979_v22 = vpack.c.bf16 (!%p165_p3), %v267_v21, %v266_v20  ;;  %v269_v24 = vld [vmem:[%s1265_s1 + $0x78] sm:$0xff] (!%p165_p3)  ;;  %v1182_v56 = vld [vmem:[%s1266_s2] ss:$0 sm:$0xff] (!%p165_p3) }
   0xc   : > { %v983_v25 = vpack.c.bf16 (!%p165_p3), %v269_v24, %v268_v23 }
   0xe   : > { %s1273_s22 = smov (!%p195_p4, %s820_s22), 63  ;;  %962 = vmatpush3.bf16.msra.mxu0 %v959_v5  ;;  %996 = vmatpush3.bf16.msra.mxu1 %v959_v5 }
   0xf   : > { %s821_s29 = sshll.u32 %s1273_s22, 3  ;;  %964 = vmatprep.subr.bf16.mxu0 %v963_v8  ;;  %989 = vmatprep.subr.bf16.mxu1 %v963_v8 }
  0x10   : > { %s1121_s9 = scalar_lea.vmem %s1264_s0, %s821_s29  ;;  %s1189_s8 = scalar_lea.vmem %s1267_s3, %s821_s29 }
  0x11   : > { %v302_v11 = vld [vmem:[%s1121_s9] sm:$0xff]  ;;  %v303_v26 = vld [vmem:[%s1121_s9 + $0x8] sm:$0xff]  ;;  %v304_v28 = vld [vmem:[%s1121_s9 + $0x10] sm:$0xff] }
  0x12   : > { %v318_v12 = vld [vmem:[%s1121_s9 + $0x80] sm:$0xff]  ;;  %907 = vmatprep.mubr.f32.mxu0 %v302_v11  ;;  %966 = vmatpush3.bf16.msra.mxu0 %v963_v8  ;;  %v319_v27 = vld [vmem:[%s1121_s9 + $0x88] sm:$0xff]  ;;  %v320_v29 = vld [vmem:[%s1121_s9 + $0x90] sm:$0xff] }
  0x13   : > { %931 = vmatprep.mubr.f32.mxu1 %v318_v12  ;;  %997 = vmatpush3.bf16.msra.mxu1 %v963_v8  ;;  %v305_v30 = vld [vmem:[%s1121_s9 + $0x18] sm:$0xff]  ;;  %v306_v32 = vld [vmem:[%s1121_s9 + $0x20] sm:$0xff]  ;;  %v307_v34 = vld [vmem:[%s1121_s9 + $0x28] sm:$0xff] }
  0x14   : > { %968 = vmatprep.subr.bf16.mxu0 %v967_v13  ;;  %990 = vmatprep.subr.bf16.mxu1 %v967_v13  ;;  %v321_v31 = vld [vmem:[%s1121_s9 + $0x98] sm:$0xff]  ;;  %v322_v33 = vld [vmem:[%s1121_s9 + $0xa0] sm:$0xff]  ;;  %v323_v35 = vld [vmem:[%s1121_s9 + $0xa8] sm:$0xff] }
  0x15   : > { %v308_v36 = vld [vmem:[%s1121_s9 + $0x30] sm:$0xff]  ;;  %v309_v38 = vld [vmem:[%s1121_s9 + $0x38] sm:$0xff]  ;;  %v310_v40 = vld [vmem:[%s1121_s9 + $0x40] sm:$0xff] }
  0x16   : > { %970 = vmatpush3.bf16.msra.mxu0 %v967_v13  ;;  %v324_v37 = vld [vmem:[%s1121_s9 + $0xb0] sm:$0xff]  ;;  %v325_v39 = vld [vmem:[%s1121_s9 + $0xb8] sm:$0xff]  ;;  %v326_v41 = vld [vmem:[%s1121_s9 + $0xc0] sm:$0xff] }
  0x17   : > { %998 = vmatpush3.bf16.msra.mxu1 %v967_v13  ;;  %972 = vmatprep.subr.bf16.mxu0 %v971_v16  ;;  %v311_v42 = vld [vmem:[%s1121_s9 + $0x48] sm:$0xff]  ;;  %v312_v44 = vld [vmem:[%s1121_s9 + $0x50] sm:$0xff]  ;;  %v313_v46 = vld [vmem:[%s1121_s9 + $0x58] sm:$0xff] }
  0x18   : > { %991 = vmatprep.subr.bf16.mxu1 %v971_v16  ;;  %v327_v43 = vld [vmem:[%s1121_s9 + $0xc8] sm:$0xff]  ;;  %v328_v45 = vld [vmem:[%s1121_s9 + $0xd0] sm:$0xff]  ;;  %v329_v47 = vld [vmem:[%s1121_s9 + $0xd8] sm:$0xff] }
  0x19   : > { %v314_v48 = vld [vmem:[%s1121_s9 + $0x60] sm:$0xff]  ;;  %v315_v50 = vld [vmem:[%s1121_s9 + $0x68] sm:$0xff]  ;;  %v316_v52 = vld [vmem:[%s1121_s9 + $0x70] sm:$0xff] }
  0x1a   : > { %974 = vmatpush3.bf16.msra.mxu0 %v971_v16  ;;  %v330_v49 = vld [vmem:[%s1121_s9 + $0xe0] sm:$0xff]  ;;  %v331_v51 = vld [vmem:[%s1121_s9 + $0xe8] sm:$0xff]  ;;  %v332_v53 = vld [vmem:[%s1121_s9 + $0xf0] sm:$0xff] }
  0x1b   : > { %999 = vmatpush3.bf16.msra.mxu1 %v971_v16  ;;  %976 = vmatprep.subr.bf16.mxu0 %v975_v19  ;;  %v317_v54 = vld [vmem:[%s1121_s9 + $0x78] sm:$0xff] }
  0x1c   : > { %992 = vmatprep.subr.bf16.mxu1 %v975_v19  ;;  %v333_v55 = vld [vmem:[%s1121_s9 + $0xf8] sm:$0xff] }
  0x1e   : > { %978 = vmatpush3.bf16.msra.mxu0 %v975_v19 }
  0x1f   : > { %1000 = vmatpush3.bf16.msra.mxu1 %v975_v19  ;;  %980 = vmatprep.subr.bf16.mxu0 %v979_v22 }
  0x20   : > { %993 = vmatprep.subr.bf16.mxu1 %v979_v22 }
  0x22   : > { %982 = vmatpush3.bf16.msra.mxu0 %v979_v22 }
  0x23   : > { %1001 = vmatpush3.bf16.msra.mxu1 %v979_v22  ;;  %984 = vmatprep.subr.bf16.mxu0 %v983_v25 }
  0x24   : > { %994 = vmatprep.subr.bf16.mxu1 %v983_v25 }
  0x26   : > { %986 = vmatpush3.bf16.msra.mxu0 %v983_v25 }
  0x27   : > { %1002 = vmatpush3.bf16.msra.mxu1 %v983_v25 }
  0x29   : > { %908 = vmatmul.mubr.f32.vlgmr.msra.gmra.mrb[0].mxu0 %v303_v26 }
  0x2a   : > { %932 = vmatmul.mubr.f32.vlgmr.msra.gmra.mrb[0].mxu1 %v319_v27  ;;  %910 = vmatprep.mubr.f32.mxu0 %v304_v28 }
  0x2b   : > { %934 = vmatprep.mubr.f32.mxu1 %v320_v29 }
  0x2d   : > { %911 = vmatmul.mubr.f32.gmra.mrb[2].mxu0 %v305_v30 }
  0x2e   : > { %935 = vmatmul.mubr.f32.gmra.mrb[2].mxu1 %v321_v31  ;;  %913 = vmatprep.mubr.f32.mxu0 %v306_v32 }
  0x2f   : > { %937 = vmatprep.mubr.f32.mxu1 %v322_v33 }
  0x31   : > { %914 = vmatmul.mubr.f32.gmra.mrb[4].mxu0 %v307_v34 }
  0x32   : > { %938 = vmatmul.mubr.f32.gmra.mrb[4].mxu1 %v323_v35  ;;  %916 = vmatprep.mubr.f32.mxu0 %v308_v36 }
  0x33   : > { %940 = vmatprep.mubr.f32.mxu1 %v324_v37 }
  0x35   : > { %917 = vmatmul.mubr.f32.gmra.mrb[6].mxu0 %v309_v38 }
  0x36   : > { %941 = vmatmul.mubr.f32.gmra.mrb[6].mxu1 %v325_v39  ;;  %919 = vmatprep.mubr.f32.mxu0 %v310_v40 }
  0x37   : > { %943 = vmatprep.mubr.f32.mxu1 %v326_v41 }
  0x39   : > { %920 = vmatmul.mubr.f32.gmra.mrb[8].mxu0 %v311_v42 }
  0x3a   : > { %944 = vmatmul.mubr.f32.gmra.mrb[8].mxu1 %v327_v43  ;;  %922 = vmatprep.mubr.f32.mxu0 %v312_v44 }
  0x3b   : > { %946 = vmatprep.mubr.f32.mxu1 %v328_v45 }
  0x3d   : > { %923 = vmatmul.mubr.f32.gmra.mrb[10].mxu0 %v313_v46 }
  0x3e   : > { %947 = vmatmul.mubr.f32.gmra.mrb[10].mxu1 %v329_v47  ;;  %925 = vmatprep.mubr.f32.mxu0 %v314_v48 }
  0x3f   : > { %949 = vmatprep.mubr.f32.mxu1 %v330_v49 }
  0x41   : > { %926 = vmatmul.mubr.f32.gmra.mrb[12].mxu0 %v315_v50 }
  0x42   : > { %950 = vmatmul.mubr.f32.gmra.mrb[12].mxu1 %v331_v51  ;;  %928 = vmatprep.mubr.f32.mxu0 %v316_v52 }
  0x43   : > { %952 = vmatprep.mubr.f32.mxu1 %v332_v53 }
  0x45   : > { %929 = vmatmul.mubr.f32.gmra.mrb[14].mxu0 %v317_v54 }
  0x46   : > { %953 = vmatmul.mubr.f32.gmra.mrb[14].mxu1 %v333_v55 }
  0xfc   : > { %v909_v57 = vpop.f32.mrb[0].mxu0 }
  0xfd   : > { %v933_v58 = vpop.f32.mrb[0].mxu1  ;;  %v667_v59 = vadd.f32 %v909_v57, %v1182_v56  ;;  %v400_v61 = vpop.f32.mrb[1].mxu0 }
  0xfe   : > { %v683_v60 = vadd.f32 %v933_v58, %v1182_v56  ;;  %v480_v62 = vpop.f32.mrb[1].mxu1  ;;  %v666_v63 = vadd.f32 %v1182_v56, %v400_v61 }
  0xff   : > { %v682_v0 = vadd.f32 %v1182_v56, %v480_v62  ;;  %699 = vst [vmem:[%s1189_s8 + $0x8] sm:$0xff] %v667_v59 }
 0x100   : > { %715 = vst [vmem:[%s1189_s8 + $0x88] sm:$0xff] %v683_v60  ;;  %698 = vst [vmem:[%s1189_s8] sm:$0xff] %v666_v63  ;;  %v912_v1 = vpop.f32.mrb[2].mxu0 }
 0x101   : > { %714 = vst [vmem:[%s1189_s8 + $0x80] sm:$0xff] %v682_v0  ;;  %v936_v2 = vpop.f32.mrb[2].mxu1  ;;  %v669_v3 = vadd.f32 %v912_v1, %v1182_v56  ;;  %v410_v5 = vpop.f32.mrb[3].mxu0 }
 0x102   : > { %v685_v4 = vadd.f32 %v936_v2, %v1182_v56  ;;  %v490_v6 = vpop.f32.mrb[3].mxu1  ;;  %v668_v7 = vadd.f32 %v1182_v56, %v410_v5 }
 0x103   : > { %v684_v8 = vadd.f32 %v1182_v56, %v490_v6  ;;  %701 = vst [vmem:[%s1189_s8 + $0x18] sm:$0xff] %v669_v3 }
 0x104   : > { %717 = vst [vmem:[%s1189_s8 + $0x98] sm:$0xff] %v685_v4  ;;  %700 = vst [vmem:[%s1189_s8 + $0x10] sm:$0xff] %v668_v7  ;;  %v915_v9 = vpop.f32.mrb[4].mxu0 }
 0x105   : > { %716 = vst [vmem:[%s1189_s8 + $0x90] sm:$0xff] %v684_v8  ;;  %v939_v10 = vpop.f32.mrb[4].mxu1  ;;  %v671_v11 = vadd.f32 %v915_v9, %v1182_v56  ;;  %v420_v13 = vpop.f32.mrb[5].mxu0 }
 0x106   : > { %v687_v12 = vadd.f32 %v939_v10, %v1182_v56  ;;  %v500_v14 = vpop.f32.mrb[5].mxu1  ;;  %v670_v15 = vadd.f32 %v1182_v56, %v420_v13 }
 0x107   : > { %v686_v16 = vadd.f32 %v1182_v56, %v500_v14  ;;  %703 = vst [vmem:[%s1189_s8 + $0x28] sm:$0xff] %v671_v11 }
 0x108   : > { %719 = vst [vmem:[%s1189_s8 + $0xa8] sm:$0xff] %v687_v12  ;;  %702 = vst [vmem:[%s1189_s8 + $0x20] sm:$0xff] %v670_v15  ;;  %v918_v17 = vpop.f32.mrb[6].mxu0 }
 0x109   : > { %718 = vst [vmem:[%s1189_s8 + $0xa0] sm:$0xff] %v686_v16  ;;  %v942_v18 = vpop.f32.mrb[6].mxu1  ;;  %v673_v19 = vadd.f32 %v918_v17, %v1182_v56  ;;  %v430_v21 = vpop.f32.mrb[7].mxu0 }
 0x10a   : > { %v689_v20 = vadd.f32 %v942_v18, %v1182_v56  ;;  %v510_v22 = vpop.f32.mrb[7].mxu1  ;;  %v672_v23 = vadd.f32 %v1182_v56, %v430_v21 }
 0x10b   : > { %v688_v24 = vadd.f32 %v1182_v56, %v510_v22  ;;  %705 = vst [vmem:[%s1189_s8 + $0x38] sm:$0xff] %v673_v19 }
 0x10c   : > { %721 = vst [vmem:[%s1189_s8 + $0xb8] sm:$0xff] %v689_v20  ;;  %704 = vst [vmem:[%s1189_s8 + $0x30] sm:$0xff] %v672_v23  ;;  %v921_v25 = vpop.f32.mrb[8].mxu0 }
 0x10d   : > { %720 = vst [vmem:[%s1189_s8 + $0xb0] sm:$0xff] %v688_v24  ;;  %v945_v26 = vpop.f32.mrb[8].mxu1  ;;  %v675_v27 = vadd.f32 %v921_v25, %v1182_v56  ;;  %v440_v29 = vpop.f32.mrb[9].mxu0 }
 0x10e   : > { %v691_v28 = vadd.f32 %v945_v26, %v1182_v56  ;;  %v520_v30 = vpop.f32.mrb[9].mxu1  ;;  %v674_v31 = vadd.f32 %v1182_v56, %v440_v29 }
 0x10f   : > { %v690_v32 = vadd.f32 %v1182_v56, %v520_v30  ;;  %707 = vst [vmem:[%s1189_s8 + $0x48] sm:$0xff] %v675_v27 }
 0x110   : > { %723 = vst [vmem:[%s1189_s8 + $0xc8] sm:$0xff] %v691_v28  ;;  %706 = vst [vmem:[%s1189_s8 + $0x40] sm:$0xff] %v674_v31  ;;  %v924_v33 = vpop.f32.mrb[10].mxu0 }
 0x111   : > { %722 = vst [vmem:[%s1189_s8 + $0xc0] sm:$0xff] %v690_v32  ;;  %v948_v34 = vpop.f32.mrb[10].mxu1  ;;  %v677_v35 = vadd.f32 %v924_v33, %v1182_v56  ;;  %v450_v37 = vpop.f32.mrb[11].mxu0 }
 0x112   : > { %v693_v36 = vadd.f32 %v948_v34, %v1182_v56  ;;  %v530_v38 = vpop.f32.mrb[11].mxu1  ;;  %v676_v39 = vadd.f32 %v1182_v56, %v450_v37 }
 0x113   : > { %v692_v40 = vadd.f32 %v1182_v56, %v530_v38  ;;  %709 = vst [vmem:[%s1189_s8 + $0x58] sm:$0xff] %v677_v35 }
 0x114   : > { %725 = vst [vmem:[%s1189_s8 + $0xd8] sm:$0xff] %v693_v36  ;;  %708 = vst [vmem:[%s1189_s8 + $0x50] sm:$0xff] %v676_v39  ;;  %v927_v41 = vpop.f32.mrb[12].mxu0 }
 0x115   : > { %724 = vst [vmem:[%s1189_s8 + $0xd0] sm:$0xff] %v692_v40  ;;  %v951_v42 = vpop.f32.mrb[12].mxu1  ;;  %v679_v43 = vadd.f32 %v927_v41, %v1182_v56  ;;  %v460_v45 = vpop.f32.mrb[13].mxu0 }
 0x116   : > { %v695_v44 = vadd.f32 %v951_v42, %v1182_v56  ;;  %v540_v46 = vpop.f32.mrb[13].mxu1  ;;  %v678_v47 = vadd.f32 %v1182_v56, %v460_v45 }
 0x117   : > { %v694_v48 = vadd.f32 %v1182_v56, %v540_v46  ;;  %711 = vst [vmem:[%s1189_s8 + $0x68] sm:$0xff] %v679_v43 }
 0x118   : > { %727 = vst [vmem:[%s1189_s8 + $0xe8] sm:$0xff] %v695_v44  ;;  %710 = vst [vmem:[%s1189_s8 + $0x60] sm:$0xff] %v678_v47  ;;  %v930_v49 = vpop.f32.mrb[14].mxu0 }
 0x119   : > { %726 = vst [vmem:[%s1189_s8 + $0xe0] sm:$0xff] %v694_v48  ;;  %v954_v50 = vpop.f32.mrb[14].mxu1  ;;  %v681_v51 = vadd.f32 %v930_v49, %v1182_v56  ;;  %v470_v53 = vpop.f32.mrb[15].mxu0 }
 0x11a   : > { %v697_v52 = vadd.f32 %v954_v50, %v1182_v56  ;;  %v550_v54 = vpop.f32.mrb[15].mxu1  ;;  %v680_v55 = vadd.f32 %v1182_v56, %v470_v53 }
 0x11b   : > { %v696_v57 = vadd.f32 %v1182_v56, %v550_v54  ;;  %713 = vst [vmem:[%s1189_s8 + $0x78] sm:$0xff] %v681_v51 }
 0x11c   : > { %729 = vst [vmem:[%s1189_s8 + $0xf8] sm:$0xff] %v697_v52  ;;  %712 = vst [vmem:[%s1189_s8 + $0x70] sm:$0xff] %v680_v55 }
 0x11d   : > { %728 = vst [vmem:[%s1189_s8 + $0xf0] sm:$0xff] %v696_v57 }
 0x11e PF: > { %s13_s14 = sadd.s32 1, %s1049_s14   ;;  %s1268_s12 = smov %s1045_s13 }
 0x11f   : > { %p10_p5 = scmp.ge.s32.totalorder %s13_s14, 4   ;;  %s1269_s13 = smov %s1271_s15 }
 0x121   :  { %12 = sbr.rel (!%p10_p5) target bundleno = 2 (0x2), region = 72 }

</bundles_post_ra>
